<compile_context>
chip_gen: v7x
topology: tpu7x:2x2x1
jax: 0.10.0
libtpu: 0.0.40
codegen_flags: <defaults>
</compile_context>

<pallas_src>
import functools
import math
import numpy as np
import jax
import jax.numpy as jnp
from jax.experimental import pallas as pl
from jax.experimental.pallas import tpu as pltpu

EPS = 1e-5
HIGHEST = jax.lax.Precision.HIGHEST


# ------------------------------ Pallas kernel ------------------------------ #
def convgf_kernel(xd_ref, pp_ref, agg_ref, wf_ref, wi_ref, o_ref, *, T2, LF):
    # xd_ref : (R, 2*LF) f32   rows = (channel, batch) pairs of the block;
    #                          lanes [0,T2) = even time samples, [LF,LF+T2) = odd,
    #                          zero elsewhere.
    # pp_ref : (R, 20)   f32   packed per-channel params (repeated per batch row)
    # agg_ref: (R, R)    f32   block-diagonal 1/(B*T) aggregation (BN stats)
    # wf_ref : (2LF, 2LF) bf16 fused ortho-rfft matrix (columns = [Re | Im])
    # wi_ref : (2LF, LT)  bf16 fused ortho-irfft matrix (rows = [Re ; Im]),
    #                          zero-padded columns [T, LT) for lane-dense stores
    # o_ref  : (R, LT)   f32   output (time axis padded to LT; host slices :T)
    xd = xd_ref[...]
    pp = pp_ref[...]
    agg = agg_ref[...]

    col = lambda j: pp[:, j:j + 1]          # (R, 1) per-row (== per-channel) scalar
    R = xd.shape[0]

    # Hoisted once: JAX does not CSE broadcast_in_dim, and channel_stats is
    # called twice (pre- and post-norm).
    lane128 = jax.lax.broadcasted_iota(jnp.int32, (R, 128), 1)
    is_l0 = lane128 == 0
    is_l1 = lane128 == 1

    def channel_stats(v):
        # One-pass per-channel mean / mean-of-squares; reduced over the B rows
        # of each channel and broadcast straight back to rows via a tiny
        # block-diagonal matmul (keeps everything rank-2, no reshapes).
        rs = jnp.sum(v, axis=-1, keepdims=True)             # (R, 1)
        rss = jnp.sum(v * v, axis=-1, keepdims=True)        # (R, 1)
        packed = jnp.where(is_l0, rs, 0.0) + jnp.where(is_l1, rss, 0.0)
        # Tiny matmul; HIGHEST keeps the BN statistics at f32 accuracy.
        red = jnp.dot(agg, packed, precision=HIGHEST,
                      preferred_element_type=jnp.float32)   # (R, 128)
        m = red[:, 0:1]
        return m, red[:, 1:2] - m * m

    # --------------- pre BatchNorm1d (training-mode batch stats) ------------
    mu, var = channel_stats(xd)
    scale = col(16) * jax.lax.rsqrt(var + EPS)              # gamma_pre / sigma
    xn = xd * scale + (col(17) - mu * scale)                # (R, 2*LF)

    # --------------- fn1/fn2: reflect-pad(3,4) + dw conv(k=7, stride=2) -----
    # Evaluated on the VPU as 7 shifted copies of the even/odd halves of xn.
    E = xn[:, :LF]
    O = xn[:, LF:]
    E2 = jnp.concatenate([E, E], axis=-1)                   # 128-aligned concat
    O2 = jnp.concatenate([O, O], axis=-1)

    def sh(a2, s):
        # cyclic shift of the LF-wide base: out[:, f] = base[:, (f - s) % LF]
        start = (LF - s) % LF
        return a2[:, start:start + LF]

    Ep1, Ep2, Em1 = sh(E2, 1), sh(E2, 2), sh(E2, -1)
    Op1, Op2, Op3, Om1 = sh(O2, 1), sh(O2, 2), sh(O2, 3), sh(O2, -1)

    f_idx = jax.lax.broadcasted_iota(jnp.int32, (R, LF), 1)
    is0 = f_idx == 0
    is1 = f_idx == 1
    isN = f_idx == T2                 # Nyquist output bin (f == T//2)
    isNm1 = f_idx == T2 - 1

    # tap k of the stride-2 conv on the reflect-padded signal (boundary-fixed)
    taps = (
        jnp.where(is0, Om1, jnp.where(is1, Op1, Op2)),      # k = 0
        jnp.where(is0, Em1, Ep1),                           # k = 1
        jnp.where(is0, O, Op1),                             # k = 2
        jnp.where(isN, Ep1, E),                             # k = 3
        jnp.where(isN, Op2, O),                             # k = 4
        jnp.where(isNm1, E, jnp.where(isN, Ep2, Em1)),      # k = 5
        jnp.where(isNm1, Op1, jnp.where(isN, Op3, Om1)),    # k = 6
    )
    rw = col(14)                        # conv bias b1
    iw = col(15)                        # conv bias b2
    for k in range(7):
        rw = rw + col(k) * taps[k]      # w1[c, k]
        iw = iw + col(7 + k) * taps[k]  # w2[c, k]

    # --------------- rfft(norm='ortho'): one fused bf16 MXU matmul ----------
    xri = jnp.dot(xn.astype(jnp.bfloat16), wf_ref[...],
                  preferred_element_type=jnp.float32)       # (R, 2*LF) = [Re|Im]
    xr = xri[:, :LF]
    xi = xri[:, LF:]

    # --------------- spectral complex multiply (f32, VPU) -------------------
    yr = xr * rw - xi * iw
    yi = xr * iw + xi * rw
    yri = jnp.concatenate([yr, yi], axis=-1)                # 128-aligned concat

    # --------------- irfft(n=T, norm='ortho'): one fused bf16 matmul --------
    # Columns [T, LT) of wi are zero, so y[:, T:] == 0 exactly (stats stay exact)
    y = jnp.dot(yri.astype(jnp.bfloat16), wi_ref[...],
                preferred_element_type=jnp.float32)         # (R, LT)

    # --------------- post BatchNorm1d ----------------------------------------
    mu2, var2 = channel_stats(y)
    scale2 = col(18) * jax.lax.rsqrt(var2 + EPS)
    o_ref[...] = (y * scale2 + (col(19) - mu2 * scale2)).astype(o_ref.dtype)


# ----------------------------- host-side glue ------------------------------ #
def build_fwd_dft(T, LF):
    """Fused [Re | Im] ortho-rfft matrix for the de-interleaved [even|odd] layout."""
    T2, F = T // 2, T // 2 + 1
    s = 1.0 / np.sqrt(T)
    f = np.arange(F, dtype=np.float64)[None, :]
    wf = np.zeros((2 * LF, 2 * LF), dtype=np.float64)
    for half, t0 in ((0, 0.0), (1, 1.0)):                   # even rows, odd rows
        t = (2.0 * np.arange(T2, dtype=np.float64) + t0)[:, None]
        ang = 2.0 * np.pi * t * f / T
        r0 = half * LF
        wf[r0:r0 + T2, :F] = np.cos(ang) * s                # -> Re(rfft)
        wf[r0:r0 + T2, LF:LF + F] = -np.sin(ang) * s        # -> Im(rfft)
    return wf


def build_inv_dft(T, LF, LT):
    """Fused [Re ; Im] ortho-irfft matrix; time columns zero-padded to LT."""
    T2, F = T // 2, T // 2 + 1
    s = 1.0 / np.sqrt(T)
    f = np.arange(F, dtype=np.float64)[:, None]
    t = np.arange(T, dtype=np.float64)[None, :]
    ang = 2.0 * np.pi * f * t / T
    coef = np.full((F, 1), 2.0)
    coef[0, 0] = 1.0
    coef[-1, 0] = 1.0                                       # Nyquist bin (T even)
    wi = np.zeros((2 * LF, LT), dtype=np.float64)
    wi[:F, :T] = coef * np.cos(ang) * s
    wi[LF:LF + F, :T] = -coef * np.sin(ang) * s
    return wi


def _pick_channel_block(C, B):
    """Largest divisor of C with at most 256 (Cb*B) rows per grid step."""
    best = 1
    for cb in range(1, C + 1):
        if C % cb == 0 and cb * B <= 256:
            best = cb
    return best


def convgf_forward(x, params):
    B, C, T = x.shape
    if T % 2 != 0 or T < 8:
        raise ValueError("ConvGF Pallas kernel requires even T >= 8")
    T2 = T // 2
    F = T2 + 1
    LF = ((F + 127) // 128) * 128            # lane-dense (128-aligned) freq axis
    LT = ((T + 127) // 128) * 128            # lane-dense (128-aligned) output time axis

    Cb = _pick_channel_block(C, B)
    G = C // Cb
    R = Cb * B

    # --- activations: (B,C,T) -> (G, R, 2*LF), [even | odd] samples, padded ---
    xt = jnp.transpose(x.astype(jnp.float32), (1, 0, 2))    # (C, B, T)
    pad = ((0, 0), (0, 0), (0, LF - T2))
    xd = jnp.concatenate([jnp.pad(xt[..., 0::2], pad),
                          jnp.pad(xt[..., 1::2], pad)], axis=-1)   # (C, B, 2LF)
    xd = xd.reshape(G, R, 2 * LF)

    # --- packed per-channel params, repeated per batch row: (G, R, 20) --------
    def cvec(name, n):
        return jnp.asarray(params[name], jnp.float32).reshape(C, n)
    pc = jnp.concatenate([cvec('w1', 7), cvec('w2', 7),
                          cvec('b1', 1), cvec('b2', 1),
                          cvec('g_pre', 1), cvec('b_pre', 1),
                          cvec('g_post', 1), cvec('b_post', 1)], axis=-1)
    pp = jnp.repeat(pc, B, axis=0).reshape(G, R, 20)

    # --- shared constants (fetched once: constant index maps) -----------------
    agg = jnp.asarray(np.kron(np.eye(Cb), np.ones((B, B))) / (B * T), jnp.float32)
    wf = jnp.asarray(build_fwd_dft(T, LF), jnp.bfloat16)      # (2LF, 2LF)
    wi = jnp.asarray(build_inv_dft(T, LF, LT), jnp.bfloat16)  # (2LF, LT)

    kernel = functools.partial(convgf_kernel, T2=T2, LF=LF)

    out = pl.pallas_call(
        kernel,
        out_shape=jax.ShapeDtypeStruct((G, R, LT), jnp.float32),
        grid=(G,),
        in_specs=[
            pl.BlockSpec((None, R, 2 * LF), lambda g: (g, 0, 0)),   # activations
            pl.BlockSpec((None, R, 20), lambda g: (g, 0, 0)),       # packed params
            pl.BlockSpec((R, R), lambda g: (0, 0)),                 # BN aggregation
            pl.BlockSpec((2 * LF, 2 * LF), lambda g: (0, 0)),       # fused rfft
            pl.BlockSpec((2 * LF, LT), lambda g: (0, 0)),           # fused irfft
        ],
        out_specs=pl.BlockSpec((None, R, LT), lambda g: (g, 0, 0)),
        compiler_params=pltpu.CompilerParams(
            dimension_semantics=("parallel",),
            vmem_limit_bytes=32 * 1024 * 1024),   # footprint < 4 MiB; safe on v5e/v6e/v7x
    )(xd, pp, agg, wf, wi)

    # strip the lane-dense time padding, back to (B, C, T)
    return jnp.transpose(out.reshape(C, B, LT)[..., :T], (1, 0, 2))


# --------------------- pure-JAX reference (for checking) ------------------- #
def convgf_reference(x, params):
    def bn(z, gw, bw):
        mu = z.mean(axis=(0, 2), keepdims=True)
        var = ((z - mu) ** 2).mean(axis=(0, 2), keepdims=True)
        return (z - mu) / jnp.sqrt(var + EPS) * gw[None, :, None] + bw[None, :, None]

    def dwconv(z, w, b):
        out = jax.lax.conv_general_dilated(
            z, w, window_strides=(2,), padding='VALID',
            dimension_numbers=('NCH', 'OIH', 'NCH'),
            feature_group_count=z.shape[1], precision=HIGHEST)
        return out + b[None, :, None]

    B, C, T = x.shape
    xn = bn(x, params['g_pre'], params['b_pre'])
    xp = jnp.pad(xn, ((0, 0), (0, 0), (3, 4)), mode='reflect')
    rw = dwconv(xp, params['w1'], params['b1'])
    iw = dwconv(xp, params['w2'], params['b2'])
    weight = rw + 1j * iw
    X = jnp.fft.rfft(xn, axis=-1, norm='ortho')
    y = jnp.fft.irfft(X * weight, n=T, axis=-1, norm='ortho')
    return bn(y, params['g_post'], params['b_post'])


if __name__ == "__main__":
    dim = 8               # ConvGF(dim=8): forward operates on dim // 2 = 4 channels
    C = dim // 2
    B, T = 2, 16

    key = jax.random.PRNGKey(0)
    kx, kw1, kb1, kw2, kb2 = jax.random.split(key, 5)
    bound = 1.0 / math.sqrt(7.0)  # PyTorch Conv1d default init bound (fan_in = 1*7)
    params = {
        'w1': jax.random.uniform(kw1, (C, 1, 7), jnp.float32, -bound, bound),
        'b1': jax.random.uniform(kb1, (C,), jnp.float32, -bound, bound),
        'w2': jax.random.uniform(kw2, (C, 1, 7), jnp.float32, -bound, bound),
        'b2': jax.random.uniform(kb2, (C,), jnp.float32, -bound, bound),
        'g_pre': jnp.ones((C,), jnp.float32),     # BatchNorm default affine init
        'b_pre': jnp.zeros((C,), jnp.float32),
        'g_post': jnp.ones((C,), jnp.float32),
        'b_post': jnp.zeros((C,), jnp.float32),
    }
    x = jax.random.normal(kx, (B, C, T), jnp.float32)

    out = jax.block_until_ready(convgf_forward(x, params))
    ref = jax.block_until_ready(convgf_reference(x, params))

    assert out.shape == (B, C, T)
    err = float(jnp.max(jnp.abs(out - ref)))
    # DFT matmuls use bf16 MXU operands; outputs are unit-variance post-BN, so
    # a 5e-2 absolute bound leaves a wide margin over the expected <~2e-2
    # worst-case bf16 rounding.
    if not np.isfinite(err) or err > 5e-2:
        raise AssertionError(f"Pallas ConvGF mismatch vs reference: max abs err {err}")
    print("KERNEL_OK")
</pallas_src>

<mosaic_0001>
module attributes {stable_mosaic.version = 11 : i64} {
  func.func @convgf_kernel(%arg0: i32, %arg1: memref<1x8x256xf32, #tpu.memory_space<vmem>>, %arg2: memref<1x8x20xf32, #tpu.memory_space<vmem>>, %arg3: memref<8x8xf32, #tpu.memory_space<vmem>>, %arg4: memref<256x256xbf16, #tpu.memory_space<vmem>>, %arg5: memref<256x128xbf16, #tpu.memory_space<vmem>>, %arg6: memref<1x8x128xf32, #tpu.memory_space<vmem>>) attributes {dimension_semantics = [#tpu.dimension_semantics<parallel>], iteration_bounds = array<i64: 1>, scalar_prefetch = 0 : i64, scratch_operands = 0 : i64, tpu.core_type = #tpu.core_type<tc>, window_params = [{transform_indices = @transform_0, window_bounds = array<i64: 1, 8, 256>}, {transform_indices = @transform_1, window_bounds = array<i64: 1, 8, 20>}, {pipeline_mode = #tpu.pipeline_mode<synchronous>, transform_indices = @transform_2, window_bounds = array<i64: 8, 8>}, {pipeline_mode = #tpu.pipeline_mode<synchronous>, transform_indices = @transform_3, window_bounds = array<i64: 256, 256>}, {pipeline_mode = #tpu.pipeline_mode<synchronous>, transform_indices = @transform_4, window_bounds = array<i64: 256, 128>}, {transform_indices = @transform_5, window_bounds = array<i64: 1, 8, 128>}]} {
    %c0 = arith.constant 0 : index
    %c0_0 = arith.constant 0 : index
    %c0_1 = arith.constant 0 : index
    %0 = vector.load %arg1[%c0, %c0_0, %c0_1] : memref<1x8x256xf32, #tpu.memory_space<vmem>>, vector<1x8x256xf32>
    %1 = vector.shape_cast %0 : vector<1x8x256xf32> to vector<8x256xf32>
    %c0_2 = arith.constant 0 : index
    %c0_3 = arith.constant 0 : index
    %c0_4 = arith.constant 0 : index
    %2 = vector.load %arg2[%c0_2, %c0_3, %c0_4] : memref<1x8x20xf32, #tpu.memory_space<vmem>>, vector<1x8x20xf32>
    %3 = vector.shape_cast %2 : vector<1x8x20xf32> to vector<8x20xf32>
    %c0_5 = arith.constant 0 : index
    %c0_6 = arith.constant 0 : index
    %4 = vector.load %arg3[%c0_5, %c0_6] : memref<8x8xf32, #tpu.memory_space<vmem>>, vector<8x8xf32>
    %5 = tpu.iota {dimensions = array<i32: 1>} : vector<8x128xi32>
    %c0_i32 = arith.constant 0 : i32
    %6 = vector.broadcast %c0_i32 : i32 to vector<8x128xi32>
    %7 = arith.cmpi eq, %5, %6 : vector<8x128xi32>
    %c1_i32 = arith.constant 1 : i32
    %8 = vector.broadcast %c1_i32 : i32 to vector<8x128xi32>
    %9 = arith.cmpi eq, %5, %8 : vector<8x128xi32>
    %cst = arith.constant dense<0.000000e+00> : vector<8xf32>
    %10 = vector.multi_reduction <add>, %1, %cst [1] : vector<8x256xf32> to vector<8xf32>
    %11 = vector.shape_cast %10 : vector<8xf32> to vector<8x1xf32>
    %12 = arith.mulf %1, %1 : vector<8x256xf32>
    %cst_7 = arith.constant dense<0.000000e+00> : vector<8xf32>
    %13 = vector.multi_reduction <add>, %12, %cst_7 [1] : vector<8x256xf32> to vector<8xf32>
    %14 = vector.shape_cast %13 : vector<8xf32> to vector<8x1xf32>
    %cst_8 = arith.constant 0.000000e+00 : f32
    %15 = vector.shape_cast %11 : vector<8x1xf32> to vector<8x1xf32>
    %16 = vector.broadcast %15 : vector<8x1xf32> to vector<8x128xf32>
    %17 = vector.broadcast %cst_8 : f32 to vector<8x128xf32>
    %18 = arith.select %7, %16, %17 : vector<8x128xi1>, vector<8x128xf32>
    %cst_9 = arith.constant 0.000000e+00 : f32
    %19 = vector.shape_cast %14 : vector<8x1xf32> to vector<8x1xf32>
    %20 = vector.broadcast %19 : vector<8x1xf32> to vector<8x128xf32>
    %21 = vector.broadcast %cst_9 : f32 to vector<8x128xf32>
    %22 = arith.select %9, %20, %21 : vector<8x128xi1>, vector<8x128xf32>
    %23 = arith.addf %18, %22 : vector<8x128xf32>
    %cst_10 = arith.constant dense<0.000000e+00> : vector<8x128xf32>
    %24 = tpu.matmul %4, %23, %cst_10 {dimension_numbers = #tpu.dot_dimension_numbers<[1], [0], [0], [1], [0, 0, 1, 1], [], []>, precision = #tpu.contract_precision<fp32>} : vector<8x8xf32>, vector<8x128xf32>, vector<8x128xf32> -> vector<8x128xf32>
    %25 = vector.extract_strided_slice %24 {offsets = [0, 0], sizes = [8, 1], strides = [1, 1]} : vector<8x128xf32> to vector<8x1xf32>
    %26 = vector.extract_strided_slice %24 {offsets = [0, 1], sizes = [8, 1], strides = [1, 1]} : vector<8x128xf32> to vector<8x1xf32>
    %27 = arith.mulf %25, %25 : vector<8x1xf32>
    %28 = arith.subf %26, %27 : vector<8x1xf32>
    %29 = vector.extract_strided_slice %3 {offsets = [0, 16], sizes = [8, 1], strides = [1, 1]} : vector<8x20xf32> to vector<8x1xf32>
    %cst_11 = arith.constant 9.99999974E-6 : f32
    %30 = vector.broadcast %cst_11 : f32 to vector<8x1xf32>
    %31 = arith.addf %28, %30 : vector<8x1xf32>
    %32 = math.rsqrt %31 : vector<8x1xf32>
    %33 = arith.mulf %29, %32 : vector<8x1xf32>
    %34 = vector.broadcast %33 : vector<8x1xf32> to vector<8x256xf32>
    %35 = arith.mulf %1, %34 : vector<8x256xf32>
    %36 = vector.extract_strided_slice %3 {offsets = [0, 17], sizes = [8, 1], strides = [1, 1]} : vector<8x20xf32> to vector<8x1xf32>
    %37 = arith.mulf %25, %33 : vector<8x1xf32>
    %38 = arith.subf %36, %37 : vector<8x1xf32>
    %39 = vector.broadcast %38 : vector<8x1xf32> to vector<8x256xf32>
    %40 = arith.addf %35, %39 : vector<8x256xf32>
    %41 = vector.extract_strided_slice %40 {offsets = [0, 0], sizes = [8, 128], strides = [1, 1]} : vector<8x256xf32> to vector<8x128xf32>
    %42 = vector.extract_strided_slice %40 {offsets = [0, 128], sizes = [8, 128], strides = [1, 1]} : vector<8x256xf32> to vector<8x128xf32>
    %43 = tpu.concatenate %41, %41 in 1 : vector<8x128xf32>, vector<8x128xf32> -> vector<8x256xf32>
    %44 = tpu.concatenate %42, %42 in 1 : vector<8x128xf32>, vector<8x128xf32> -> vector<8x256xf32>
    %45 = vector.extract_strided_slice %43 {offsets = [0, 127], sizes = [8, 128], strides = [1, 1]} : vector<8x256xf32> to vector<8x128xf32>
    %46 = vector.extract_strided_slice %43 {offsets = [0, 126], sizes = [8, 128], strides = [1, 1]} : vector<8x256xf32> to vector<8x128xf32>
    %47 = vector.extract_strided_slice %43 {offsets = [0, 1], sizes = [8, 128], strides = [1, 1]} : vector<8x256xf32> to vector<8x128xf32>
    %48 = vector.extract_strided_slice %44 {offsets = [0, 127], sizes = [8, 128], strides = [1, 1]} : vector<8x256xf32> to vector<8x128xf32>
    %49 = vector.extract_strided_slice %44 {offsets = [0, 126], sizes = [8, 128], strides = [1, 1]} : vector<8x256xf32> to vector<8x128xf32>
    %50 = vector.extract_strided_slice %44 {offsets = [0, 125], sizes = [8, 128], strides = [1, 1]} : vector<8x256xf32> to vector<8x128xf32>
    %51 = vector.extract_strided_slice %44 {offsets = [0, 1], sizes = [8, 128], strides = [1, 1]} : vector<8x256xf32> to vector<8x128xf32>
    %52 = tpu.iota {dimensions = array<i32: 1>} : vector<8x128xi32>
    %c0_i32_12 = arith.constant 0 : i32
    %53 = vector.broadcast %c0_i32_12 : i32 to vector<8x128xi32>
    %54 = arith.cmpi eq, %52, %53 : vector<8x128xi32>
    %c1_i32_13 = arith.constant 1 : i32
    %55 = vector.broadcast %c1_i32_13 : i32 to vector<8x128xi32>
    %56 = arith.cmpi eq, %52, %55 : vector<8x128xi32>
    %c8_i32 = arith.constant 8 : i32
    %57 = vector.broadcast %c8_i32 : i32 to vector<8x128xi32>
    %58 = arith.cmpi eq, %52, %57 : vector<8x128xi32>
    %c7_i32 = arith.constant 7 : i32
    %59 = vector.broadcast %c7_i32 : i32 to vector<8x128xi32>
    %60 = arith.cmpi eq, %52, %59 : vector<8x128xi32>
    %61 = arith.select %56, %48, %49 : vector<8x128xi1>, vector<8x128xf32>
    %62 = arith.select %54, %51, %61 : vector<8x128xi1>, vector<8x128xf32>
    %63 = arith.select %54, %47, %45 : vector<8x128xi1>, vector<8x128xf32>
    %64 = arith.select %54, %42, %48 : vector<8x128xi1>, vector<8x128xf32>
    %65 = arith.select %58, %45, %41 : vector<8x128xi1>, vector<8x128xf32>
    %66 = arith.select %58, %49, %42 : vector<8x128xi1>, vector<8x128xf32>
    %67 = arith.select %58, %46, %47 : vector<8x128xi1>, vector<8x128xf32>
    %68 = arith.select %60, %41, %67 : vector<8x128xi1>, vector<8x128xf32>
    %69 = arith.select %58, %50, %51 : vector<8x128xi1>, vector<8x128xf32>
    %70 = arith.select %60, %48, %69 : vector<8x128xi1>, vector<8x128xf32>
    %71 = vector.extract_strided_slice %3 {offsets = [0, 14], sizes = [8, 1], strides = [1, 1]} : vector<8x20xf32> to vector<8x1xf32>
    %72 = vector.extract_strided_slice %3 {offsets = [0, 15], sizes = [8, 1], strides = [1, 1]} : vector<8x20xf32> to vector<8x1xf32>
    %73 = vector.extract_strided_slice %3 {offsets = [0, 0], sizes = [8, 1], strides = [1, 1]} : vector<8x20xf32> to vector<8x1xf32>
    %74 = vector.broadcast %73 : vector<8x1xf32> to vector<8x128xf32>
    %75 = arith.mulf %74, %62 : vector<8x128xf32>
    %76 = vector.broadcast %71 : vector<8x1xf32> to vector<8x128xf32>
    %77 = arith.addf %76, %75 : vector<8x128xf32>
    %78 = vector.extract_strided_slice %3 {offsets = [0, 7], sizes = [8, 1], strides = [1, 1]} : vector<8x20xf32> to vector<8x1xf32>
    %79 = vector.broadcast %78 : vector<8x1xf32> to vector<8x128xf32>
    %80 = arith.mulf %79, %62 : vector<8x128xf32>
    %81 = vector.broadcast %72 : vector<8x1xf32> to vector<8x128xf32>
    %82 = arith.addf %81, %80 : vector<8x128xf32>
    %83 = vector.extract_strided_slice %3 {offsets = [0, 1], sizes = [8, 1], strides = [1, 1]} : vector<8x20xf32> to vector<8x1xf32>
    %84 = vector.broadcast %83 : vector<8x1xf32> to vector<8x128xf32>
    %85 = arith.mulf %84, %63 : vector<8x128xf32>
    %86 = arith.addf %77, %85 : vector<8x128xf32>
    %87 = vector.extract_strided_slice %3 {offsets = [0, 8], sizes = [8, 1], strides = [1, 1]} : vector<8x20xf32> to vector<8x1xf32>
    %88 = vector.broadcast %87 : vector<8x1xf32> to vector<8x128xf32>
    %89 = arith.mulf %88, %63 : vector<8x128xf32>
    %90 = arith.addf %82, %89 : vector<8x128xf32>
    %91 = vector.extract_strided_slice %3 {offsets = [0, 2], sizes = [8, 1], strides = [1, 1]} : vector<8x20xf32> to vector<8x1xf32>
    %92 = vector.broadcast %91 : vector<8x1xf32> to vector<8x128xf32>
    %93 = arith.mulf %92, %64 : vector<8x128xf32>
    %94 = arith.addf %86, %93 : vector<8x128xf32>
    %95 = vector.extract_strided_slice %3 {offsets = [0, 9], sizes = [8, 1], strides = [1, 1]} : vector<8x20xf32> to vector<8x1xf32>
    %96 = vector.broadcast %95 : vector<8x1xf32> to vector<8x128xf32>
    %97 = arith.mulf %96, %64 : vector<8x128xf32>
    %98 = arith.addf %90, %97 : vector<8x128xf32>
    %99 = vector.extract_strided_slice %3 {offsets = [0, 3], sizes = [8, 1], strides = [1, 1]} : vector<8x20xf32> to vector<8x1xf32>
    %100 = vector.broadcast %99 : vector<8x1xf32> to vector<8x128xf32>
    %101 = arith.mulf %100, %65 : vector<8x128xf32>
    %102 = arith.addf %94, %101 : vector<8x128xf32>
    %103 = vector.extract_strided_slice %3 {offsets = [0, 10], sizes = [8, 1], strides = [1, 1]} : vector<8x20xf32> to vector<8x1xf32>
    %104 = vector.broadcast %103 : vector<8x1xf32> to vector<8x128xf32>
    %105 = arith.mulf %104, %65 : vector<8x128xf32>
    %106 = arith.addf %98, %105 : vector<8x128xf32>
    %107 = vector.extract_strided_slice %3 {offsets = [0, 4], sizes = [8, 1], strides = [1, 1]} : vector<8x20xf32> to vector<8x1xf32>
    %108 = vector.broadcast %107 : vector<8x1xf32> to vector<8x128xf32>
    %109 = arith.mulf %108, %66 : vector<8x128xf32>
    %110 = arith.addf %102, %109 : vector<8x128xf32>
    %111 = vector.extract_strided_slice %3 {offsets = [0, 11], sizes = [8, 1], strides = [1, 1]} : vector<8x20xf32> to vector<8x1xf32>
    %112 = vector.broadcast %111 : vector<8x1xf32> to vector<8x128xf32>
    %113 = arith.mulf %112, %66 : vector<8x128xf32>
    %114 = arith.addf %106, %113 : vector<8x128xf32>
    %115 = vector.extract_strided_slice %3 {offsets = [0, 5], sizes = [8, 1], strides = [1, 1]} : vector<8x20xf32> to vector<8x1xf32>
    %116 = vector.broadcast %115 : vector<8x1xf32> to vector<8x128xf32>
    %117 = arith.mulf %116, %68 : vector<8x128xf32>
    %118 = arith.addf %110, %117 : vector<8x128xf32>
    %119 = vector.extract_strided_slice %3 {offsets = [0, 12], sizes = [8, 1], strides = [1, 1]} : vector<8x20xf32> to vector<8x1xf32>
    %120 = vector.broadcast %119 : vector<8x1xf32> to vector<8x128xf32>
    %121 = arith.mulf %120, %68 : vector<8x128xf32>
    %122 = arith.addf %114, %121 : vector<8x128xf32>
    %123 = vector.extract_strided_slice %3 {offsets = [0, 6], sizes = [8, 1], strides = [1, 1]} : vector<8x20xf32> to vector<8x1xf32>
    %124 = vector.broadcast %123 : vector<8x1xf32> to vector<8x128xf32>
    %125 = arith.mulf %124, %70 : vector<8x128xf32>
    %126 = arith.addf %118, %125 : vector<8x128xf32>
    %127 = vector.extract_strided_slice %3 {offsets = [0, 13], sizes = [8, 1], strides = [1, 1]} : vector<8x20xf32> to vector<8x1xf32>
    %128 = vector.broadcast %127 : vector<8x1xf32> to vector<8x128xf32>
    %129 = arith.mulf %128, %70 : vector<8x128xf32>
    %130 = arith.addf %122, %129 : vector<8x128xf32>
    %131 = arith.truncf %40 : vector<8x256xf32> to vector<8x256xbf16>
    %c0_14 = arith.constant 0 : index
    %c0_15 = arith.constant 0 : index
    %132 = vector.load %arg4[%c0_14, %c0_15] : memref<256x256xbf16, #tpu.memory_space<vmem>>, vector<256x256xbf16>
    %cst_16 = arith.constant dense<0.000000e+00> : vector<8x256xf32>
    %133 = tpu.matmul %131, %132, %cst_16 {dimension_numbers = #tpu.dot_dimension_numbers<[1], [0], [0], [1], [0, 0, 1, 1], [], []>} : vector<8x256xbf16>, vector<256x256xbf16>, vector<8x256xf32> -> vector<8x256xf32>
    %134 = vector.extract_strided_slice %133 {offsets = [0, 0], sizes = [8, 128], strides = [1, 1]} : vector<8x256xf32> to vector<8x128xf32>
    %135 = vector.extract_strided_slice %133 {offsets = [0, 128], sizes = [8, 128], strides = [1, 1]} : vector<8x256xf32> to vector<8x128xf32>
    %136 = arith.mulf %134, %126 : vector<8x128xf32>
    %137 = arith.mulf %135, %130 : vector<8x128xf32>
    %138 = arith.subf %136, %137 : vector<8x128xf32>
    %139 = arith.mulf %134, %130 : vector<8x128xf32>
    %140 = arith.mulf %135, %126 : vector<8x128xf32>
    %141 = arith.addf %139, %140 : vector<8x128xf32>
    %142 = tpu.concatenate %138, %141 in 1 : vector<8x128xf32>, vector<8x128xf32> -> vector<8x256xf32>
    %143 = arith.truncf %142 : vector<8x256xf32> to vector<8x256xbf16>
    %c0_17 = arith.constant 0 : index
    %c0_18 = arith.constant 0 : index
    %144 = vector.load %arg5[%c0_17, %c0_18] : memref<256x128xbf16, #tpu.memory_space<vmem>>, vector<256x128xbf16>
    %cst_19 = arith.constant dense<0.000000e+00> : vector<8x128xf32>
    %145 = tpu.matmul %143, %144, %cst_19 {dimension_numbers = #tpu.dot_dimension_numbers<[1], [0], [0], [1], [0, 0, 1, 1], [], []>} : vector<8x256xbf16>, vector<256x128xbf16>, vector<8x128xf32> -> vector<8x128xf32>
    %cst_20 = arith.constant dense<0.000000e+00> : vector<8xf32>
    %146 = vector.multi_reduction <add>, %145, %cst_20 [1] : vector<8x128xf32> to vector<8xf32>
    %147 = vector.shape_cast %146 : vector<8xf32> to vector<8x1xf32>
    %148 = arith.mulf %145, %145 : vector<8x128xf32>
    %cst_21 = arith.constant dense<0.000000e+00> : vector<8xf32>
    %149 = vector.multi_reduction <add>, %148, %cst_21 [1] : vector<8x128xf32> to vector<8xf32>
    %150 = vector.shape_cast %149 : vector<8xf32> to vector<8x1xf32>
    %cst_22 = arith.constant 0.000000e+00 : f32
    %151 = vector.shape_cast %147 : vector<8x1xf32> to vector<8x1xf32>
    %152 = vector.broadcast %151 : vector<8x1xf32> to vector<8x128xf32>
    %153 = vector.broadcast %cst_22 : f32 to vector<8x128xf32>
    %154 = arith.select %7, %152, %153 : vector<8x128xi1>, vector<8x128xf32>
    %cst_23 = arith.constant 0.000000e+00 : f32
    %155 = vector.shape_cast %150 : vector<8x1xf32> to vector<8x1xf32>
    %156 = vector.broadcast %155 : vector<8x1xf32> to vector<8x128xf32>
    %157 = vector.broadcast %cst_23 : f32 to vector<8x128xf32>
    %158 = arith.select %9, %156, %157 : vector<8x128xi1>, vector<8x128xf32>
    %159 = arith.addf %154, %158 : vector<8x128xf32>
    %cst_24 = arith.constant dense<0.000000e+00> : vector<8x128xf32>
    %160 = tpu.matmul %4, %159, %cst_24 {dimension_numbers = #tpu.dot_dimension_numbers<[1], [0], [0], [1], [0, 0, 1, 1], [], []>, precision = #tpu.contract_precision<fp32>} : vector<8x8xf32>, vector<8x128xf32>, vector<8x128xf32> -> vector<8x128xf32>
    %161 = vector.extract_strided_slice %160 {offsets = [0, 0], sizes = [8, 1], strides = [1, 1]} : vector<8x128xf32> to vector<8x1xf32>
    %162 = vector.extract_strided_slice %160 {offsets = [0, 1], sizes = [8, 1], strides = [1, 1]} : vector<8x128xf32> to vector<8x1xf32>
    %163 = arith.mulf %161, %161 : vector<8x1xf32>
    %164 = arith.subf %162, %163 : vector<8x1xf32>
    %165 = vector.extract_strided_slice %3 {offsets = [0, 18], sizes = [8, 1], strides = [1, 1]} : vector<8x20xf32> to vector<8x1xf32>
    %cst_25 = arith.constant 9.99999974E-6 : f32
    %166 = vector.broadcast %cst_25 : f32 to vector<8x1xf32>
    %167 = arith.addf %164, %166 : vector<8x1xf32>
    %168 = math.rsqrt %167 : vector<8x1xf32>
    %169 = arith.mulf %165, %168 : vector<8x1xf32>
    %170 = vector.broadcast %169 : vector<8x1xf32> to vector<8x128xf32>
    %171 = arith.mulf %145, %170 : vector<8x128xf32>
    %172 = vector.extract_strided_slice %3 {offsets = [0, 19], sizes = [8, 1], strides = [1, 1]} : vector<8x20xf32> to vector<8x1xf32>
    %173 = arith.mulf %161, %169 : vector<8x1xf32>
    %174 = arith.subf %172, %173 : vector<8x1xf32>
    %175 = vector.broadcast %174 : vector<8x1xf32> to vector<8x128xf32>
    %176 = arith.addf %171, %175 : vector<8x128xf32>
    %c0_26 = arith.constant 0 : index
    %c0_27 = arith.constant 0 : index
    %c0_28 = arith.constant 0 : index
    %177 = vector.load %arg6[%c0_26, %c0_27, %c0_28] : memref<1x8x128xf32, #tpu.memory_space<vmem>>, vector<1x8x128xf32>
    %178 = vector.shape_cast %177 : vector<1x8x128xf32> to vector<8x128xf32>
    %179 = vector.shape_cast %176 : vector<8x128xf32> to vector<1x8x128xf32>
    tpu.vector_store %arg6[%c0_26, %c0_27, %c0_28], %179 {strides = array<i32>} : memref<1x8x128xf32, #tpu.memory_space<vmem>>, vector<1x8x128xf32>,
    return
  }
  func.func @transform_0(%arg0: i32) -> (i32, i32, i32) {
    %c0_i32 = arith.constant 0 : i32
    %c0_i32_0 = arith.constant 0 : i32
    %c0_i32_1 = arith.constant 0 : i32
    return %arg0, %c0_i32, %c0_i32_0 : i32, i32, i32
  }
  func.func @transform_1(%arg0: i32) -> (i32, i32, i32) {
    %c0_i32 = arith.constant 0 : i32
    %c0_i32_0 = arith.constant 0 : i32
    %c0_i32_1 = arith.constant 0 : i32
    return %arg0, %c0_i32, %c0_i32_0 : i32, i32, i32
  }
  func.func @transform_2(%arg0: i32) -> (i32, i32) {
    %c0_i32 = arith.constant 0 : i32
    %c0_i32_0 = arith.constant 0 : i32
    %c0_i32_1 = arith.constant 0 : i32
    return %c0_i32, %c0_i32_0 : i32, i32
  }
  func.func @transform_3(%arg0: i32) -> (i32, i32) {
    %c0_i32 = arith.constant 0 : i32
    %c0_i32_0 = arith.constant 0 : i32
    %c0_i32_1 = arith.constant 0 : i32
    return %c0_i32, %c0_i32_0 : i32, i32
  }
  func.func @transform_4(%arg0: i32) -> (i32, i32) {
    %c0_i32 = arith.constant 0 : i32
    %c0_i32_0 = arith.constant 0 : i32
    %c0_i32_1 = arith.constant 0 : i32
    return %c0_i32, %c0_i32_0 : i32, i32
  }
  func.func @transform_5(%arg0: i32) -> (i32, i32, i32) {
    %c0_i32 = arith.constant 0 : i32
    %c0_i32_0 = arith.constant 0 : i32
    %c0_i32_1 = arith.constant 0 : i32
    return %arg0, %c0_i32, %c0_i32_0 : i32, i32, i32
  }
}

</mosaic_0001>

<bundles_post_ra>
// kernel: tpu_custom_call.1
= control target key start
LH: loop header
LB: loop body
LE: loop exit
PB: predicated region body
PF: predicated region fallthrough
CT: control target
= control target key end

     0   :  { %10 = vsyncpa [#allocation3], 0  ;;  %s2373_s0 = inlined_call_operand.hbm [shape: f32[1,8,256], index: 0, kind: input, shape index: {}]   ;;  %s2374_s1 = inlined_call_operand.hbm [shape: f32[1,8,20], index: 1, kind: input, shape index: {}]   ;;  %s2375_s2 = inlined_call_operand.hbm [shape: f32[8,8], index: 2, kind: input, shape index: {}]   ;;  %s2376_s3 = inlined_call_operand.hbm [shape: bf16[256,256], index: 3, kind: input, shape index: {}]   ;;  %s2377_s4 = inlined_call_operand.hbm [shape: bf16[256,128], index: 4, kind: input, shape index: {}]   ;;  %s2378_s5 = inlined_call_operand.hbm [shape: f32[1,8,128], index: 5, kind: output, shape index: {}]  }
   0x1   :  { %11 = vsyncpa [#allocation6], 0 }
   0x2   :  { %12 = vsyncpa [#allocation9], 0 }
   0x3   :  { %13 = vsyncpa [#allocation4], 0  ;;  %s2076_s18 = smov [#allocation5]   ;;  %s2077_s20 = smov [#allocation8]  }
   0x4   :  { %s30_s19 = sshll.u32 %s2076_s18, 4  ;;  %s49_s21 = sshll.u32 %s2077_s20, 4  ;;  %s31_s19 = int_to_ptr.vmem [resolvable:$true] %s30_s19  ;;  %s2147_s21 = int_to_ptr.vmem [resolvable:$true] %s49_s21 }
   0x5   :  { %s1936_s24 = scalar_lea.hbm %s2374_s1, 128 }
   0x6   :  { %p1937_p0 = scmp.ne.s32.totalorder %s2374_s1, %s1936_s24  ;;  %p1940_p1 = scmp.lt.u32.totalorder %s1936_s24, %s2374_s1 }
   0x8   :  { %p1942_p2 = pnand %p1940_p1, %p1937_p0 }
   0xa   :  { %1945 = shalt.err (!%p1942_p2)
}
   0xb   :  { %s1946_s29 = scalar_lea.vmem %s31_s19, 128  ;;  %p1951_p4 = scmp.lt.s32.totalorder %s31_s19, %s31_s19 }
   0xc   :  { %p1947_p3 = scmp.ne.s32.totalorder %s31_s19, %s1946_s29  ;;  %p1952_p5 = scmp.lt.s32.totalorder %s1946_s29, %s1946_s29 }
   0xe   :  { %p1953_p6 = por %p1952_p5, %p1951_p4 }
  0x10   :  { %p1954_p7 = pnand %p1953_p6, %p1947_p3 }
  0x12   :  { %1957 = shalt.err (!%p1954_p7)
}
  0x13   :  { %33 = dma.hbm_to_vmem [thread:$0]  %s2374_s1, 128, %s31_s19, [#allocation6]  }
  0x14   :  { %s1958_s9 = scalar_lea.hbm %s2376_s3, 4096 }
  0x15   :  { %p1959_p8 = scmp.ne.s32.totalorder %s2376_s3, %s1958_s9  ;;  %p1962_p9 = scmp.lt.u32.totalorder %s1958_s9, %s2376_s3 }
  0x17   :  { %p1964_p10 = pnand %p1962_p9, %p1959_p8 }
  0x19   :  { %1967 = shalt.err (!%p1964_p10)
}
  0x1a   :  { %s1968_s14 = scalar_lea.vmem %s2147_s21, 4096  ;;  %p1973_p12 = scmp.lt.s32.totalorder %s2147_s21, %s2147_s21 }
  0x1b   :  { %p1969_p11 = scmp.ne.s32.totalorder %s2147_s21, %s1968_s14  ;;  %p1974_p13 = scmp.lt.s32.totalorder %s1968_s14, %s1968_s14 }
  0x1d   :  { %p1975_p0 = por %p1974_p13, %p1973_p12 }
  0x1f   :  { %p1976_p1 = pnand %p1975_p0, %p1969_p11 }
  0x21   :  { %1979 = shalt.err (!%p1976_p1)
}
  0x22   :  { %s2078_s1 = smov 128   ;;  %s2079_s15 = smov 8  }
  0x23   :  { %55 = dma.hbm_to_vmem [thread:$0]  %s2376_s3, 4096, %s2147_s21, [#allocation9], %s2078_s1, %s2078_s1, %s2079_s15  }
  0x24   :  { %s2080_s18 = smov [#allocation2]   ;;  %s2081_s20 = smov [#allocation7]  }
  0x25   :  { %s20_s19 = sshll.u32 %s2080_s18, 4  ;;  %s40_s22 = sshll.u32 %s2081_s20, 4  ;;  %s21_s19 = int_to_ptr.vmem [resolvable:$true] %s20_s19  ;;  %s41_s22 = int_to_ptr.vmem [resolvable:$true] %s40_s22 }
  0x26   :  { %s1980_s25 = scalar_lea.hbm %s2373_s0, 256 }
  0x27   :  { %p1981_p2 = scmp.ne.s32.totalorder %s2373_s0, %s1980_s25  ;;  %p1984_p3 = scmp.lt.u32.totalorder %s1980_s25, %s2373_s0 }
  0x29   :  { %p1986_p4 = pnand %p1984_p3, %p1981_p2 }
  0x2b   :  { %1989 = shalt.err (!%p1986_p4)
}
  0x2c   :  { %s1990_s3 = scalar_lea.vmem %s21_s19, 256  ;;  %p1995_p6 = scmp.lt.s32.totalorder %s21_s19, %s21_s19 }
  0x2d   :  { %p1991_p5 = scmp.ne.s32.totalorder %s21_s19, %s1990_s3  ;;  %p1996_p7 = scmp.lt.s32.totalorder %s1990_s3, %s1990_s3 }
  0x2f   :  { %p1997_p8 = por %p1996_p7, %p1995_p6 }
  0x31   :  { %p1998_p9 = pnand %p1997_p8, %p1991_p5 }
  0x33   :  { %2001 = shalt.err (!%p1998_p9)
}
  0x34   :  { %23 = dma.hbm_to_vmem [thread:$0]  %s2373_s0, 256, %s21_s19, [#allocation3]  }
  0x35   :  { %s2002_s8 = scalar_lea.hbm %s2375_s2, 128 }
  0x36   :  { %p2003_p10 = scmp.ne.s32.totalorder %s2375_s2, %s2002_s8  ;;  %p2006_p11 = scmp.lt.u32.totalorder %s2002_s8, %s2375_s2 }
  0x38   :  { %p2008_p12 = pnand %p2006_p11, %p2003_p10 }
  0x3a   :  { %2011 = shalt.err (!%p2008_p12)
}
  0x3b   :  { %s2012_s13 = scalar_lea.vmem %s41_s22, 128  ;;  %p2017_p0 = scmp.lt.s32.totalorder %s41_s22, %s41_s22 }
  0x3c   :  { %p2013_p13 = scmp.ne.s32.totalorder %s41_s22, %s2012_s13  ;;  %p2018_p1 = scmp.lt.s32.totalorder %s2012_s13, %s2012_s13 }
  0x3e   :  { %p2019_p2 = por %p2018_p1, %p2017_p0 }
  0x40   :  { %p2020_p3 = pnand %p2019_p2, %p2013_p13 }
  0x42   :  { %2023 = shalt.err (!%p2020_p3)
}
  0x43   :  { %43 = dma.hbm_to_vmem [thread:$0]  %s2375_s2, 128, %s41_s22, [#allocation6]  }
  0x44   :  { %s2082_s1 = smov [#allocation10]   ;;  %s2024_s18 = scalar_lea.hbm %s2377_s4, 2048 }
  0x45   :  { %s61_s15 = sshll.u32 %s2082_s1, 4  ;;  %p2025_p4 = scmp.ne.s32.totalorder %s2377_s4, %s2024_s18  ;;  %s62_s15 = int_to_ptr.vmem [resolvable:$true] %s61_s15 }
  0x46   :  { %p2028_p5 = scmp.lt.u32.totalorder %s2024_s18, %s2377_s4 }
  0x48   :  { %p2030_p6 = pnand %p2028_p5, %p2025_p4 }
  0x4a   :  { %2033 = shalt.err (!%p2030_p6)
}
  0x4b   :  { %s2034_s25 = scalar_lea.vmem %s62_s15, 2048  ;;  %p2039_p8 = scmp.lt.s32.totalorder %s62_s15, %s62_s15 }
  0x4c   :  { %p2035_p7 = scmp.ne.s32.totalorder %s62_s15, %s2034_s25  ;;  %p2040_p9 = scmp.lt.s32.totalorder %s2034_s25, %s2034_s25 }
  0x4e   :  { %p2041_p10 = por %p2040_p9, %p2039_p8 }
  0x50   :  { %p2042_p11 = pnand %p2041_p10, %p2035_p7 }
  0x52   :  { %2045 = shalt.err (!%p2042_p11)
}
  0x53   :  { %s2083_s2 = smov 64   ;;  %s2084_s22 = smov 4  }
  0x54   :  { %67 = dma.hbm_to_vmem [thread:$0]  %s2377_s4, 2048, %s62_s15, [#allocation9], %s2083_s2, %s2083_s2, %s2084_s22  }
  0x55   :  { %2068 = dma.done.wait [#allocation3], 256  }
  0x56   :  { %2069 = vsyncadd [#allocation3], 4294967040 }
  0x57   :  { %2070 = dma.done.wait [#allocation6], 256  }
  0x58   :  { %2071 = vsyncadd [#allocation6], 4294967040 }
  0x59   :  { %2072 = dma.done.wait [#allocation9], 6144  }
  0x5a   :  { %2073 = vsyncadd [#allocation9], 4294961152  ;;  %v2214_v0 = vld [vmem:[#allocation2] sm:$0xff]  ;;  %v2216_v1 = vld [vmem:[#allocation2 + $0x8] sm:$0xff]  ;;  %v2085_v6 = vmov 0.0   ;;  %vm2086_vm0 = vmmov 0   ;;  %v88_v10 = vlaneseq }
  0x5b   :  { %v92_v2 = vadd.f32 %v2216_v1, %v2214_v0  ;;  %v95_v3 = vmul.f32 %v2214_v0, %v2214_v0  ;;  %v96_v4 = vmul.f32 %v2216_v1, %v2216_v1  ;;  %1728 = vmatprep.subr.mxu1 %v2085_v6  ;;  %1738 = vmatprep.subr.mxu0 %v2085_v6  ;;  %v87_v7 = vld [vmem:[#allocation7] sm:$0xff]  ;;  %vm103_vm1 = vcmask 64512   ;;  %s2087_s4 = smov 1   ;;  %s2088_s28 = smov 15   ;;  %v2269_v37 = vld [vmem:[#allocation5] sm:$0xff] }
  0x5c   :  { %1740 = vmatprep.mubr.msk.f32.mxu0 %vm2086_vm0, %v2085_v6  ;;  %1730 = vmatprep.mubr.msk.f32.mxu1 %vm2086_vm0, %v2085_v6  ;;  %v105_v8 = vsel %vm103_vm1, %v87_v7, 0  ;;  %v2235_v12 = vand.u32 127, %v88_v10  ;;  %v2089_v36 = vmov 16   ;;  %s2090_s29 = smov 112   ;;  %s2091_s3 = smov 17   ;;  %v2092_v46 = vmov 17  }
  0x5d   :  { %93 = vadd.xlane.f32.xlu0 %v92_v2  ;;  %v97_v5 = vadd.f32 %v96_v4, %v95_v3  ;;  %v2230_v9 = vand.u32 4294901760, %v105_v8  ;;  %1848 = vset.pattern.permute.xlu1 %v2089_v36  ;;  %v1868_v42 = vld [vmem:[#allocation8] ss:$8 sps:$4 sm:$0xff]   ;;  %v1870_v43 = vld [vmem:[#allocation8 + $0x4] ss:$8 sps:$4 sm:$0xff]   ;;  %v2093_v54 = vmov 15  }
  0x5e   :  { %vm90_vm2 = vcmp.eq.s32.totalorder %v2235_v12, 0  ;;  %vm91_vm3 = vcmp.eq.s32.totalorder %v2235_v12, 1  ;;  %v1873_v44 = vld [vmem:[#allocation8 + $0x14] ss:$8 sps:$4 sm:$0xff]   ;;  %v1871_v45 = vld [vmem:[#allocation8 + $0x10] ss:$8 sps:$4 sm:$0xff]   ;;  %1853 = vset.pattern.permute.xlu0 %v2093_v54 }
  0x5f   :  { %v2233_v11 = vsub.f32 %v105_v8, %v2230_v9  ;;  %v1876_v47 = vld [vmem:[#allocation8 + $0x24] ss:$8 sps:$4 sm:$0xff]   ;;  %v1874_v48 = vld [vmem:[#allocation8 + $0x20] ss:$8 sps:$4 sm:$0xff]   ;;  %v1879_v49 = vld [vmem:[#allocation8 + $0x34] ss:$8 sps:$4 sm:$0xff]  }
  0x60   :  { %v1877_v50 = vld [vmem:[#allocation8 + $0x30] ss:$8 sps:$4 sm:$0xff]   ;;  %v1882_v51 = vld [vmem:[#allocation8 + $0x44] ss:$8 sps:$4 sm:$0xff]   ;;  %v1880_v52 = vld [vmem:[#allocation8 + $0x40] ss:$8 sps:$4 sm:$0xff]  }
  0x61   :  { %98 = vadd.xlane.f32.xlu0 %v97_v5  ;;  %v2238_v13 = vand.u32 4294901760, %v2233_v11  ;;  %v1885_v53 = vld [vmem:[#allocation8 + $0x54] ss:$8 sps:$4 sm:$0xff]   ;;  %v1883_v55 = vld [vmem:[#allocation8 + $0x50] ss:$8 sps:$4 sm:$0xff]   ;;  %v2094_v57 = vmov 2  }
  0x62   :  { %v1888_v56 = vld [vmem:[#allocation8 + $0x64] ss:$8 sps:$4 sm:$0xff]   ;;  %v1886_v58 = vld [vmem:[#allocation8 + $0x60] ss:$8 sps:$4 sm:$0xff]   ;;  %v1891_v59 = vld [vmem:[#allocation8 + $0x74] ss:$8 sps:$4 sm:$0xff]  }
  0x63   :  { %v176_v15 = vsub.f32 %v2233_v11, %v2238_v13  ;;  %v2095_v60 = vmov 3   ;;  %v1889_v61 = vld [vmem:[#allocation8 + $0x70] ss:$8 sps:$4 sm:$0xff]   ;;  %v1894_v62 = vld [vmem:[#allocation8 + $0x84] ss:$8 sps:$4 sm:$0xff]   ;;  %v2096_v2 = vmov 11  }
  0x64   :  { %v1892_v63 = vld [vmem:[#allocation8 + $0x80] ss:$8 sps:$4 sm:$0xff]   ;;  %v1897_v3 = vld [vmem:[#allocation8 + $0x94] ss:$8 sps:$4 sm:$0xff]   ;;  %v1895_v4 = vld [vmem:[#allocation8 + $0x90] ss:$8 sps:$4 sm:$0xff]  }
  0x65   :  { %v2248_v20 = vand.u32 4294901760, %v176_v15  ;;  %v1900_v5 = vld [vmem:[#allocation8 + $0xa4] ss:$8 sps:$4 sm:$0xff]   ;;  %v1898_v7 = vld [vmem:[#allocation8 + $0xa0] ss:$8 sps:$4 sm:$0xff]   ;;  %v2108_v36 = vmov 13  }
  0x66   :  { %v1903_v8 = vld [vmem:[#allocation8 + $0xb4] ss:$8 sps:$4 sm:$0xff]   ;;  %v1901_v10 = vld [vmem:[#allocation8 + $0xb0] ss:$8 sps:$4 sm:$0xff]   ;;  %v1904_v15 = vld [vmem:[#allocation8 + $0xc0] ss:$8 sps:$4 sm:$0xff]  }
  0x67   :  { %s2109_s21 = smov 2   ;;  %s2110_s30 = smov 127   ;;  %v1926_v54 = vld [vmem:[#allocation10 + $0x68] sm:$0xff]   ;;  %vm589_vm4 = vcmp.eq.s32.totalorder %v2235_v12, 8  ;;  %vm590_vm5 = vcmp.eq.s32.totalorder %v2235_v12, 7 }
  0x68   :  { %s2111_s6 = smov 3   ;;  %s2113_s7 = smov 110  }
  0x69   :  { %s2115_s8 = smov 19   ;;  %s2116_s9 = smov [#allocation11]  }
  0x6a   :  { %s1623_s10 = sshll.u32 %s2116_s9, 4  ;;  %s1624_s10 = int_to_ptr.vmem [resolvable:$true] %s1623_s10 }
  0x6b   :  { %s2046_s11 = scalar_lea.vmem %s1624_s10, 128  ;;  %p2051_p13 = scmp.lt.s32.totalorder %s1624_s10, %s1624_s10 }
  0x6c   :  { %p2047_p12 = scmp.ne.s32.totalorder %s1624_s10, %s2046_s11  ;;  %p2052_p0 = scmp.lt.s32.totalorder %s2046_s11, %s2046_s11 }
  0x6e   :  { %p2053_p1 = por %p2052_p0, %p2051_p13 }
  0x70   :  { %p2054_p2 = pnand %p2053_p1, %p2047_p12 }
  0xea   :  { %v94_v14 = vpop.xlane.xlu0 %93 }
  0xeb   :  { %v100_v17 = vsel %vm90_vm2, %v94_v14, 0.0  ;;  %v1906_v14 = vld [vmem:[#allocation8 + $0xc4] ss:$8 sps:$4 sm:$0xff]  }
  0xee   :  { %v99_v16 = vpop.xlane.xlu0 %98 }
  0xef   :  { %v101_v18 = vsel %vm91_vm3, %v99_v16, 0.0  ;;  %v1909_v16 = vld [vmem:[#allocation8 + $0xd4] ss:$8 sps:$4 sm:$0xff]  }
  0xf0   :  { %v102_v19 = vadd.f32 %v101_v18, %v100_v17  ;;  %v1907_v17 = vld [vmem:[#allocation8 + $0xd0] ss:$8 sps:$4 sm:$0xff]   ;;  %v1912_v18 = vld [vmem:[#allocation8 + $0xe4] ss:$8 sps:$4 sm:$0xff]  }
  0xf2   :  { %v108_v21 = vand.u32 4294901760, %v102_v19 }
  0xf4   :  { %v185_v22 = vsub.f32 %v102_v19, %v108_v21  ;;  %1729 = vmatpush3.msra.mxu1 %v108_v21  ;;  %v1910_v19 = vld [vmem:[#allocation8 + $0xe0] ss:$8 sps:$4 sm:$0xff]  }
  0xf5   :  { %1733 = vmatprep.subr.mxu1 %v2085_v6  ;;  %1731 = vmatmul.mubr.f32.vlgmr.msra.gmra.mrb[0].mxu1 %v2248_v20 }
  0xf6   :  { %v186_v23 = vand.u32 4294901760, %v185_v22  ;;  %1739 = vmatpush3.msra.mxu0 %v185_v22  ;;  %1735 = vmatprep.mubr.msk.f32.mxu1 %vm2086_vm0, %v2085_v6 }
  0xf7   :  { %1741 = vmatmul.mubr.f32.vlgmr.msra.gmra.mrb[0].mxu0 %v2233_v11  ;;  %1743 = vmatprep.subr.mxu0 %v2085_v6 }
  0xf8   :  { %1744 = vmatpush3.msra.mxu0 %v108_v21  ;;  %v187_v24 = vsub.f32 %v185_v22, %v186_v23  ;;  %1745 = vmatprep.mubr.msk.f32.mxu0 %vm2086_vm0, %v2085_v6 }
  0xf9   :  { %1748 = vmatprep.subr.mxu0 %v2085_v6 }
  0xfa   :  { %v188_v25 = vand.u32 4294901760, %v187_v24  ;;  %v1915_v24 = vld [vmem:[#allocation8 + $0xf4] ss:$8 sps:$4 sm:$0xff]  }
  0xfc   :  { %1734 = vmatpush3.msra.mxu1 %v188_v25  ;;  %v2097_v25 = vmov 0  }
  0xfd   :  { %1736 = vmatmul.mubr.f32.vlgmr.msra.gmra.mrb[0].mxu1 %v2230_v9  ;;  %911 = vmatprep.subr.bf16.mxu1 %v1870_v43 }
  0xfe   :  { %912 = vmatpush1.bf16.msra.mxu1 %v1868_v42 }
  0xff   :  { %1746 = vmatmul.mubr.f32.vlgmr.msra.gmra.mrb[0].mxu0 %v2238_v13  ;;  %913 = vmatprep.subr.bf16.mxu1 %v1873_v44 }
 0x100   :  { %1749 = vmatpush3.msra.mxu0 %v186_v23  ;;  %1750 = vmatprep.mubr.msk.f32.mxu0 %vm2086_vm0, %v2085_v6  ;;  %v1913_v23 = vld [vmem:[#allocation8 + $0xf0] ss:$8 sps:$4 sm:$0xff]  }
 0x101   :  { %1753 = vmatprep.subr.mxu0 %v2085_v6 }
 0x102   :  { %914 = vmatpush1.bf16.msra.mxu1 %v1871_v45 }
 0x103   :  { %915 = vmatprep.subr.bf16.mxu1 %v1876_v47  ;;  %v1919_v47 = vld [vmem:[#allocation10 + $0x8] sm:$0xff]  }
 0x106   :  { %916 = vmatpush1.bf16.msra.mxu1 %v1874_v48  ;;  %v1920_v48 = vld [vmem:[#allocation10 + $0x50] sm:$0xff]  }
 0x107   :  { %1751 = vmatmul.mubr.f32.vlgmr.msra.gmra.mrb[0].mxu0 %v2230_v9  ;;  %917 = vmatprep.subr.bf16.mxu1 %v1879_v49  ;;  %v1921_v49 = vld [vmem:[#allocation10 + $0x10] sm:$0xff]  }
 0x108   :  { %1754 = vmatpush3.msra.mxu0 %v108_v21  ;;  %1755 = vmatprep.mubr.msk.f32.mxu0 %vm2086_vm0, %v2085_v6 }
 0x10a   :  { %918 = vmatpush1.bf16.msra.mxu1 %v1877_v50  ;;  %v1922_v50 = vld [vmem:[#allocation10 + $0x58] sm:$0xff]  }
 0x10b   :  { %919 = vmatprep.subr.bf16.mxu1 %v1882_v51  ;;  %v1923_v51 = vld [vmem:[#allocation10 + $0x18] sm:$0xff]  }
 0x10e   :  { %920 = vmatpush1.bf16.msra.mxu1 %v1880_v52  ;;  %v1924_v52 = vld [vmem:[#allocation10 + $0x60] sm:$0xff]  }
 0x10f   :  { %1756 = vmatmul.mubr.f32.vlgmr.msra.gmra.mrb[0].mxu0 %v2230_v9  ;;  %921 = vmatprep.subr.bf16.mxu1 %v1885_v53  ;;  %v1925_v53 = vld [vmem:[#allocation10 + $0x20] sm:$0xff]  }
 0x112   :  { %922 = vmatpush1.bf16.msra.mxu1 %v1883_v55  ;;  %v1927_v55 = vld [vmem:[#allocation10 + $0x28] sm:$0xff]  }
 0x113   :  { %923 = vmatprep.subr.bf16.mxu1 %v1888_v56  ;;  %v1928_v56 = vld [vmem:[#allocation10 + $0x70] sm:$0xff]  }
 0x116   :  { %924 = vmatpush1.bf16.msra.mxu1 %v1886_v58  ;;  %v1930_v58 = vld [vmem:[#allocation10 + $0x78] sm:$0xff]  }
 0x117   :  { %925 = vmatprep.subr.bf16.mxu1 %v1891_v59  ;;  %v1931_v59 = vld [vmem:[#allocation10 + $0x38] sm:$0xff]  }
 0x11a   :  { %926 = vmatpush1.bf16.msra.mxu1 %v1889_v61 }
 0x11b   :  { %927 = vmatprep.subr.bf16.mxu1 %v1894_v62 }
 0x11e   :  { %928 = vmatpush1.bf16.msra.mxu1 %v1892_v63 }
 0x11f   :  { %929 = vmatprep.subr.bf16.mxu1 %v1897_v3 }
 0x122   :  { %930 = vmatpush1.bf16.msra.mxu1 %v1895_v4 }
 0x123   :  { %931 = vmatprep.subr.bf16.mxu1 %v1900_v5 }
 0x126   :  { %932 = vmatpush1.bf16.msra.mxu1 %v1898_v7 }
 0x127   :  { %933 = vmatprep.subr.bf16.mxu1 %v1903_v8 }
 0x12a   :  { %934 = vmatpush1.bf16.msra.mxu1 %v1901_v10 }
 0x12b   :  { %935 = vmatprep.subr.bf16.mxu1 %v1906_v14 }
 0x12e   :  { %936 = vmatpush1.bf16.msra.mxu1 %v1904_v15 }
 0x12f   :  { %937 = vmatprep.subr.bf16.mxu1 %v1909_v16 }
 0x132   :  { %938 = vmatpush1.bf16.msra.mxu1 %v1907_v17 }
 0x133   :  { %939 = vmatprep.subr.bf16.mxu1 %v1912_v18 }
 0x136   :  { %940 = vmatpush1.bf16.msra.mxu1 %v1910_v19 }
 0x137   :  { %941 = vmatprep.subr.bf16.mxu1 %v1915_v24 }
 0x13a   :  { %942 = vmatpush1.bf16.msra.mxu1 %v1913_v23 }
 0x1d0   :  { %v255_v26 = vpop.f32.mrb[0].mxu1 }
 0x1d1   :  { %v1737_v27 = vpop.f32.mrb[1].mxu1 }
 0x1d2   :  { %v2099_v27 = vmov 7  }
 0x1e2   :  { %v549_v28 = vpop.f32.mrb[0].mxu0 }
 0x1e3   :  { %v1788_v29 = vadd.f32 %v549_v28, %v255_v26  ;;  %v1757_v30 = vpop.f32.mrb[1].mxu0  ;;  %v2098_v26 = vmov 6   ;;  %v2100_v28 = vmov 14  }
 0x1e4   :  { %v2102_v30 = vmov 8  }
 0x1e5   :  { %v553_v31 = vmul.f32 %v1788_v29, %v1788_v29 }
 0x1e7   :  { %555 = vrot.lane.b32.xlu1 %v553_v31, %s2087_s4  ;;  %v2103_v31 = vmov 9  }
 0x259   :  { %v556_v32 = vpop.permute.xlu1 %555 }
 0x25a   :  { %v558_v33 = vsub.f32 %v1788_v29, %v556_v32  ;;  %v2104_v32 = vmov 10  }
 0x25c   :  { %v559_v34 = vadd.f32 1e-05, %v558_v33  ;;  %v2105_v33 = vmov 4  }
 0x25e   :  { %1932 = vrsqrt.f32 %v559_v34  ;;  %v2106_v34 = vmov 5  }
 0x268   :  { %v1933_v35 = vpop.eup %1932 }
 0x269   :  { %562 = vrot.lane.b32.xlu1 %v1933_v35, %s2088_s28  ;;  %v2107_v35 = vmov 12  }
 0x2db   :  { %v563_v38 = vpop.permute.xlu1 %562 }
 0x2dc   :  { %v565_v39 = vmul.f32 %v563_v38, %v2269_v37 }
 0x2de   :  { %573 = vrot.lane.b32.xlu0 %v565_v39, %s2090_s29 }
 0x2e2   :  { %641 = vperm.xlu0 %1853, %v2269_v37  }
 0x2e6   :  { %1856 = vset.pattern.permute.xlu0 %v2094_v57  ;;  %v1929_v57 = vld [vmem:[#allocation10 + $0x30] sm:$0xff]  }
 0x2e7   :  { %658 = vperm.xlu0 %1856, %v2269_v37  }
 0x2eb   :  { %1858 = vset.pattern.permute.xlu0 %v2095_v60 }
 0x2ec   :  { %670 = vperm.xlu0 %1858, %v2269_v37  }
 0x2f0   :  { %1861 = vset.pattern.permute.xlu0 %v2096_v2 }
 0x2f1   :  { %688 = vperm.xlu0 %1861, %v2269_v37  }
 0x2f5   :  { %1864 = vset.pattern.permute.xlu0 %v2098_v26 }
 0x350   :  { %v574_v40 = vpop.permute.xlu0 %573 }
 0x351   :  { %v576_v41 = vmul.f32 %v1788_v29, %v574_v40  ;;  %v2101_v29 = vmov 1  }
 0x353   :  { %578 = vrot.lane.b32.xlu1 %v576_v41, %s2091_s3 }
 0x357   :  { %568 = vperm.xlu1 %1848, %v565_v39  }
 0x35b   :  { %1849 = vset.pattern.permute.xlu1 %v2092_v46  ;;  %v1918_v46 = vld [vmem:[#allocation10 + $0x48] sm:$0xff]  }
 0x361   :  { %v642_v7 = vpop.permute.xlu0 %641 }
 0x366   :  { %v659_v10 = vpop.permute.xlu0 %658 }
 0x36b   :  { %v671_v15 = vpop.permute.xlu0 %670 }
 0x370   :  { %v689_v17 = vpop.permute.xlu0 %688 }
 0x3c5   :  { %v579_v21 = vpop.permute.xlu1 %578 }
 0x3c6   :  { %v581_v22 = vsub.f32 %v2269_v37, %v579_v21 }
 0x3c8   :  { %584 = vperm.xlu1 %1849, %v581_v22  }
 0x3cc   :  { %1850 = vset.pattern.permute.xlu1 %v2097_v25 }
 0x3cd   :  { %626 = vperm.xlu1 %1850, %v2269_v37  }
 0x3d1   :  { %1851 = vset.pattern.permute.xlu1 %v2099_v27 }
 0x3d2   :  { %636 = vperm.xlu1 %1851, %v2269_v37  }
 0x3d6   :  { %1852 = vset.pattern.permute.xlu1 %v2100_v28  ;;  %v569_v38 = vpop.permute.xlu1 %568 }
 0x3d7   :  { %631 = vperm.xlu1 %1852, %v2269_v37   ;;  %v571_v39 = vmul.f32 %v569_v38, %v2214_v0  ;;  %v572_v40 = vmul.f32 %v569_v38, %v2216_v1  ;;  %v1916_v0 = vld [vmem:[#allocation10 + $0x40] sm:$0xff]  }
 0x3d8   :  { %v1917_v1 = vld [vmem:[#allocation10] sm:$0xff]   ;;  %1694 = vmatprep.subr.bf16.mxu0 %v1916_v0 }
 0x3d9   :  { %1695 = vmatpush3.bf16.msra.mxu0 %v1917_v1 }
 0x3da   :  { %1696 = vmatprep.subr.bf16.mxu0 %v1918_v46 }
 0x3db   :  { %1854 = vset.pattern.permute.xlu1 %v2101_v29 }
 0x3dc   :  { %646 = vperm.xlu1 %1854, %v2269_v37  }
 0x3dd   :  { %1697 = vmatpush3.bf16.msra.mxu0 %v1919_v47 }
 0x3de   :  { %1698 = vmatprep.subr.bf16.mxu0 %v1920_v48 }
 0x3e0   :  { %1855 = vset.pattern.permute.xlu1 %v2102_v30 }
 0x3e1   :  { %652 = vperm.xlu1 %1855, %v2269_v37   ;;  %1699 = vmatpush3.bf16.msra.mxu0 %v1921_v49 }
 0x3e2   :  { %1700 = vmatprep.subr.bf16.mxu0 %v1922_v50 }
 0x3e5   :  { %1857 = vset.pattern.permute.xlu1 %v2103_v31  ;;  %1701 = vmatpush3.bf16.msra.mxu0 %v1923_v51 }
 0x3e6   :  { %664 = vperm.xlu1 %1857, %v2269_v37   ;;  %1702 = vmatprep.subr.bf16.mxu0 %v1924_v52 }
 0x3e9   :  { %1703 = vmatpush3.bf16.msra.mxu0 %v1925_v53 }
 0x3ea   :  { %1859 = vset.pattern.permute.xlu1 %v2104_v32  ;;  %1704 = vmatprep.subr.bf16.mxu0 %v1926_v54 }
 0x3eb   :  { %676 = vperm.xlu1 %1859, %v2269_v37  }
 0x3ed   :  { %1705 = vmatpush3.bf16.msra.mxu0 %v1927_v55 }
 0x3ee   :  { %1706 = vmatprep.subr.bf16.mxu0 %v1928_v56 }
 0x3ef   :  { %1860 = vset.pattern.permute.xlu1 %v2105_v33 }
 0x3f0   :  { %682 = vperm.xlu1 %1860, %v2269_v37  }
 0x3f1   :  { %1707 = vmatpush3.bf16.msra.mxu0 %v1929_v57 }
 0x3f2   :  { %1708 = vmatprep.subr.bf16.mxu0 %v1930_v58 }
 0x3f4   :  { %1862 = vset.pattern.permute.xlu1 %v2106_v34 }
 0x3f5   :  { %694 = vperm.xlu1 %1862, %v2269_v37   ;;  %1709 = vmatpush3.bf16.msra.mxu0 %v1931_v59 }
 0x3f6   :  { %1758 = vmatprep.subr.mxu0 %v2085_v6 }
 0x3f9   :  { %1863 = vset.pattern.permute.xlu1 %v2107_v35 }
 0x3fa   :  { %700 = vperm.xlu1 %1863, %v2269_v37  }
 0x3fe   :  { %1865 = vset.pattern.permute.xlu1 %v2108_v36 }
 0x447   :  { %v585_v41 = vpop.permute.xlu1 %584 }
 0x448   :  { %v2290_v42 = vadd.f32 %v585_v41, %v571_v39  ;;  %v2292_v43 = vadd.f32 %v585_v41, %v572_v40 }
 0x44a   :  { %595 = vrot.lane.b32.xlu0 %v2292_v43, %s2109_s21  ;;  %592 = vrot.lane.b32.xlu1 %v2292_v43, %s2087_s4  ;;  %v718_v44 = vpack.c.bf16 %v2292_v43, %v2292_v43  ;;  %v717_v45 = vpack.c.bf16 %v2290_v42, %v2290_v42 }
 0x44c   :  { %943 = vmatprep.mubr.bf16.mxu1 %v718_v44  ;;  %v627_v60 = vpop.permute.xlu1 %626 }
 0x44d   :  { %944 = vmatmul.mubr.bf16.vlgmr.msra.gmra.mrb[4].mxu1 %v717_v45 }
 0x44e   :  { %599 = vrot.lane.b32.xlu1 %v2292_v43, %s2110_s30  ;;  %607 = vrot.lane.b32.xlu0 %v2290_v42, %s2087_s4 }
 0x451   :  { %v637_v61 = vpop.permute.xlu1 %636 }
 0x452   :  { %706 = vperm.xlu0 %1864, %v2269_v37   ;;  %604 = vrot.lane.b32.xlu1 %v2290_v42, %s2110_s30 }
 0x456   :  { %619 = vrot.lane.b32.xlu0 %v2292_v43, %s2111_s6  ;;  %712 = vperm.xlu1 %1865, %v2269_v37   ;;  %v632_v62 = vpop.permute.xlu1 %631 }
 0x45a   :  { %614 = vrot.lane.b32.xlu1 %v2290_v42, %s2109_s21 }
 0x45b   :  { %v647_v63 = vpop.permute.xlu1 %646 }
 0x460   :  { %v653_v2 = vpop.permute.xlu1 %652 }
 0x465   :  { %v665_v3 = vpop.permute.xlu1 %664 }
 0x46a   :  { %v677_v4 = vpop.permute.xlu1 %676 }
 0x46f   :  { %v683_v5 = vpop.permute.xlu1 %682 }
 0x474   :  { %v695_v8 = vpop.permute.xlu1 %694 }
 0x479   :  { %v701_v14 = vpop.permute.xlu1 %700 }
 0x4bc   :  { %v593_v16 = vpop.permute.xlu1 %592  ;;  %v596_v19 = vpop.permute.xlu0 %595 }
 0x4bd   :  { %v598_v21 = vsel %vm91_vm3, %v593_v16, %v596_v19  ;;  %v611_v33 = vsel %vm90_vm2, %v2292_v43, %v593_v16  ;;  %v613_v1 = vsel %vm589_vm4, %v596_v19, %v2292_v43 }
 0x4be   :  { %v661_v39 = vmul.f32 %v659_v10, %v611_v33  ;;  %v667_v40 = vmul.f32 %v665_v3, %v611_v33  ;;  %v685_v52 = vmul.f32 %v683_v5, %v613_v1  ;;  %v691_v53 = vmul.f32 %v689_v17, %v613_v1 }
 0x4c0   :  { %v600_v18 = vpop.permute.xlu1 %599  ;;  %v608_v24 = vpop.permute.xlu0 %607 }
 0x4c1   :  { %v602_v23 = vsel %vm90_vm2, %v600_v18, %v598_v21  ;;  %v612_v41 = vsel %vm589_vm4, %v608_v24, %v2290_v42 }
 0x4c2   :  { %v629_v26 = vmul.f32 %v627_v60, %v602_v23  ;;  %v639_v27 = vmul.f32 %v637_v61, %v602_v23  ;;  %v673_v46 = vmul.f32 %v671_v15, %v612_v41  ;;  %v679_v47 = vmul.f32 %v677_v4, %v612_v41 }
 0x4c4   :  { %v605_v22 = vpop.permute.xlu1 %604  ;;  %v634_v31 = vadd.f32 %v632_v62, %v629_v26  ;;  %v644_v32 = vadd.f32 %v642_v7, %v639_v27 }
 0x4c5   :  { %v610_v25 = vsel %vm90_vm2, %v605_v22, %v608_v24 }
 0x4c6   :  { %v649_v29 = vmul.f32 %v647_v63, %v610_v25  ;;  %v655_v30 = vmul.f32 %v653_v2, %v610_v25 }
 0x4c8   :  { %v650_v34 = vadd.f32 %v649_v29, %v634_v31  ;;  %v656_v35 = vadd.f32 %v655_v30, %v644_v32 }
 0x4ca   :  { %v662_v44 = vadd.f32 %v661_v39, %v650_v34  ;;  %v668_v45 = vadd.f32 %v667_v40, %v656_v35  ;;  %v2112_v39 = vmov 18  }
 0x4cb   :  { %1866 = vset.pattern.permute.xlu1 %v2112_v39 }
 0x4cc   :  { %v674_v50 = vadd.f32 %v673_v46, %v662_v44  ;;  %v680_v51 = vadd.f32 %v679_v47, %v668_v45 }
 0x4ce   :  { %v686_v57 = vadd.f32 %v685_v52, %v674_v50  ;;  %v692_v58 = vadd.f32 %v691_v53, %v680_v51 }
 0x4d1   :  { %v707_v36 = vpop.permute.xlu0 %706 }
 0x4d5   :  { %v713_v28 = vpop.permute.xlu1 %712  ;;  %v620_v48 = vpop.permute.xlu0 %619 }
 0x4d6   :  { %v622_v54 = vsel %vm589_vm4, %v620_v48, %v600_v18 }
 0x4d7   :  { %v623_v59 = vsel %vm590_vm5, %v593_v16, %v622_v54 }
 0x4d8   :  { %v709_v43 = vmul.f32 %v707_v36, %v623_v59  ;;  %v715_v62 = vmul.f32 %v713_v28, %v623_v59 }
 0x4d9   :  { %v615_v38 = vpop.permute.xlu1 %614 }
 0x4da   :  { %v617_v0 = vsel %vm589_vm4, %v615_v38, %v605_v22 }
 0x4db   :  { %v618_v49 = vsel %vm590_vm5, %v2290_v42, %v617_v0 }
 0x4dc   :  { %v697_v55 = vmul.f32 %v695_v8, %v618_v49  ;;  %v703_v56 = vmul.f32 %v701_v14, %v618_v49 }
 0x4de   :  { %v698_v60 = vadd.f32 %v697_v55, %v686_v57  ;;  %v704_v61 = vadd.f32 %v703_v56, %v692_v58 }
 0x4e0   :  { %v710_v63 = vadd.f32 %v709_v43, %v698_v60  ;;  %v716_v2 = vadd.f32 %v715_v62, %v704_v61 }
 0x520   :  { %v945_v3 = vpop.f32.mrb[4].mxu1 }
 0x521   :  { %v952_v4 = vmul.f32 %v945_v3, %v710_v63  ;;  %v955_v7 = vmul.f32 %v945_v3, %v716_v2  ;;  %v947_v42 = vpop.f32.mrb[5].mxu1 }
 0x522   :  { %v953_v10 = vmul.f32 %v947_v42, %v716_v2  ;;  %v956_v15 = vmul.f32 %v947_v42, %v710_v63  ;;  %v949_v5 = vpop.f32.mrb[6].mxu1 }
 0x523   :  { %v950_v17 = vpop.f32.mrb[7].mxu1 }
 0x524   :  { %v954_v18 = vsub.f32 %v952_v4, %v953_v10  ;;  %v957_v8 = vadd.f32 %v956_v15, %v955_v7 }
 0x526   :  { %v958_v14 = vpack.c.bf16 %v954_v18, %v954_v18  ;;  %v959_v19 = vpack.c.bf16 %v957_v8, %v957_v8 }
 0x528   :  { %1120 = vmatprep.mubr.bf16.mxu0 %v959_v19 }
 0x529   :  { %1121 = vmatmul.mubr.bf16.vlgmr.msra.gmra.mrb[4].mxu0 %v958_v14 }
 0x52a   :  { %1760 = vmatprep.mubr.msk.f32.mxu0 %vm2086_vm0, %v2085_v6 }
 0x5fc   :  { %v1710_v16 = vpop.f32.mrb[4].mxu0 }
 0x5fd   :  { %v1711_v21 = vpop.f32.mrb[5].mxu0 }
 0x5fe   :  { %v2326_v22 = vadd.f32 %v1711_v21, %v1710_v16  ;;  %v1713_v23 = vpop.f32.mrb[6].mxu0 }
 0x5ff   :  { %v1714_v24 = vpop.f32.mrb[7].mxu0 }
 0x600   :  { %1128 = vadd.xlane.f32.xlu1 %v2326_v22  ;;  %v1130_v25 = vmul.f32 %v2326_v22, %v2326_v22 }
 0x602   :  { %1131 = vadd.xlane.f32.xlu0 %v1130_v25 }
 0x68d   :  { %v1129_v26 = vpop.xlane.xlu1 %1128 }
 0x68e   :  { %v1133_v28 = vsel %vm90_vm2, %v1129_v26, 0.0 }
 0x68f   :  { %v1132_v27 = vpop.xlane.xlu0 %1131 }
 0x690   :  { %v1134_v29 = vsel %vm91_vm3, %v1132_v27, 0.0 }
 0x691   :  { %v1135_v30 = vadd.f32 %v1134_v29, %v1133_v28 }
 0x693   :  { %v1137_v31 = vand.u32 4294901760, %v1135_v30 }
 0x695   :  { %v1214_v32 = vsub.f32 %v1135_v30, %v1137_v31  ;;  %1759 = vmatpush3.msra.mxu0 %v1137_v31 }
 0x696   :  { %1761 = vmatmul.mubr.f32.vlgmr.msra.gmra.mrb[2].mxu0 %v2248_v20  ;;  %1763 = vmatprep.subr.mxu0 %v2085_v6 }
 0x697   :  { %v1215_v33 = vand.u32 4294901760, %v1214_v32  ;;  %1765 = vmatprep.mubr.msk.f32.mxu0 %vm2086_vm0, %v2085_v6 }
 0x699   :  { %v1216_v34 = vsub.f32 %v1214_v32, %v1215_v33 }
 0x69b   :  { %v1217_v35 = vand.u32 4294901760, %v1216_v34 }
 0x69d   :  { %1764 = vmatpush3.msra.mxu0 %v1217_v35 }
 0x69e   :  { %1766 = vmatmul.mubr.f32.vlgmr.msra.gmra.mrb[2].mxu0 %v2230_v9  ;;  %1768 = vmatprep.subr.mxu0 %v2085_v6 }
 0x69f   :  { %1769 = vmatpush3.msra.mxu0 %v1214_v32  ;;  %1770 = vmatprep.mubr.msk.f32.mxu0 %vm2086_vm0, %v2085_v6 }
 0x6a0   :  { %1773 = vmatprep.subr.mxu0 %v2085_v6 }
 0x6a6   :  { %1771 = vmatmul.mubr.f32.vlgmr.msra.gmra.mrb[2].mxu0 %v2233_v11 }
 0x6a7   :  { %1774 = vmatpush3.msra.mxu0 %v1137_v31  ;;  %1775 = vmatprep.mubr.msk.f32.mxu0 %vm2086_vm0, %v2085_v6 }
 0x6a8   :  { %1778 = vmatprep.subr.mxu0 %v2085_v6 }
 0x6ae   :  { %1776 = vmatmul.mubr.f32.vlgmr.msra.gmra.mrb[2].mxu0 %v2238_v13 }
 0x6af   :  { %1779 = vmatpush3.msra.mxu0 %v1215_v33  ;;  %1780 = vmatprep.mubr.msk.f32.mxu0 %vm2086_vm0, %v2085_v6 }
 0x6b0   :  { %1783 = vmatprep.subr.mxu0 %v2085_v6 }
 0x6b6   :  { %1781 = vmatmul.mubr.f32.vlgmr.msra.gmra.mrb[2].mxu0 %v2230_v9 }
 0x6b7   :  { %1784 = vmatpush3.msra.mxu0 %v1137_v31  ;;  %1785 = vmatprep.mubr.msk.f32.mxu0 %vm2086_vm0, %v2085_v6  ;;  %v2114_v6 = vmov 19  }
 0x6b8   :  { %1867 = vset.pattern.permute.xlu0 %v2114_v6 }
 0x6be   :  { %1786 = vmatmul.mubr.f32.vlgmr.msra.gmra.mrb[2].mxu0 %v2230_v9 }
 0x791   :  { %v1578_v11 = vpop.f32.mrb[2].mxu0 }
 0x792   :  { %v1582_v12 = vmul.f32 %v1578_v11, %v1578_v11  ;;  %v1787_v20 = vpop.f32.mrb[3].mxu0 }
 0x794   :  { %1584 = vrot.lane.b32.xlu0 %v1582_v12, %s2087_s4 }
 0x806   :  { %v1585_v13 = vpop.permute.xlu0 %1584 }
 0x807   :  { %v1587_v36 = vsub.f32 %v1578_v11, %v1585_v13 }
 0x809   :  { %v1588_v38 = vadd.f32 1e-05, %v1587_v36 }
 0x80b   :  { %1934 = vrsqrt.f32 %v1588_v38 }
 0x815   :  { %v1935_v40 = vpop.eup %1934 }
 0x816   :  { %1591 = vrot.lane.b32.xlu1 %v1935_v40, %s2091_s3 }
 0x888   :  { %v1592_v41 = vpop.permute.xlu1 %1591 }
 0x889   :  { %v1594_v44 = vmul.f32 %v1592_v41, %v2269_v37 }
 0x88b   :  { %1601 = vrot.lane.b32.xlu1 %v1594_v44, %s2113_s7 }
 0x88f   :  { %1597 = vperm.xlu1 %1866, %v1594_v44  }
 0x8fd   :  { %v1602_v9 = vpop.permute.xlu1 %1601 }
 0x8fe   :  { %v1604_v45 = vmul.f32 %v1602_v9, %v1578_v11 }
 0x900   :  { %1606 = vrot.lane.b32.xlu0 %v1604_v45, %s2115_s8 }
 0x90e   :  { %v1598_v46 = vpop.permute.xlu1 %1597 }
 0x90f   :  { %v1600_v47 = vmul.f32 %v2326_v22, %v1598_v46 }
 0x972   :  { %v1607_v0 = vpop.permute.xlu0 %1606 }
 0x973   :  { %v1609_v1 = vsub.f32 %v2269_v37, %v1607_v0 }
 0x975   :  { %1612 = vperm.xlu0 %1867, %v1609_v1  }
 0x9f4   :  { %v1613_v48 = vpop.permute.xlu0 %1612 }
 0x9f5   :  { %v1615_v49 = vadd.f32 %v1613_v48, %v1600_v47 }
 0x9f7   :  { %1616 = vst [vmem:[#allocation11] sm:$0xff] %v1615_v49 }
 0x9f8   :  { %2057 = shalt.err (!%p2054_p2)
}
 0x9f9   :  { %s2058_s0 = scalar_lea.hbm %s2378_s5, 128 }
 0x9fa   :  { %p2059_p3 = scmp.ne.s32.totalorder %s2378_s5, %s2058_s0  ;;  %p2062_p4 = scmp.lt.u32.totalorder %s2058_s0, %s2378_s5 }
 0x9fc   :  { %p2064_p5 = pnand %p2062_p4, %p2059_p3 }
 0x9fe   :  { %2067 = shalt.err (!%p2064_p5)
}
 0x9ff   :  { %1626 = dma.vmem_to_hbm [thread:$0]  %s1624_s10, 128, %s2378_s5, [#allocation4]  }
 0xa00   :  { %2074 = dma.done.wait [#allocation4], 128  }
 0xa01   :  { %2075 = vsyncadd [#allocation4], 4294967168 }
 0xa02   :  { %1630 = vsyncpa [#allocation3], 1 }
 0xa03   :  { %1631 = vsyncpa [#allocation6], 1 }
 0xa04   :  { %1632 = vsyncpa [#allocation9], 1 }
 0xa05   :  { %1633 = vsyncpa [#allocation4], 1 }

</bundles_post_ra>
